<compile_context>
chip_gen: v7x
topology: tpu7x:2x2x1
jax: 0.10.0
libtpu: 0.0.40
codegen_flags: <defaults>
</compile_context>

<pallas_src>
import functools

import jax
import jax.numpy as jnp
from jax import lax
from jax.experimental import pallas as pl
from jax.experimental.pallas import tpu as pltpu


HP = 128  # lane-padded width of each projection half (full-vreg, lane-dense layout)


def _head_kernel(x_ref, w_ref, o_ref, *, nb, seq, mxu_dtype):
    # x_ref: (nb*seq, C)        flattened chunk of batches
    # w_ref: (C, 2*HP)          fused weight: [ Wv | 0-pad | sqrt(scale)*Wk | 0-pad ]
    # o_ref: (nb*seq, HP)       lane-dense (padded) attention output
    x = x_ref[...].astype(mxu_dtype)
    w = w_ref[...]  # stored in mxu_dtype by the (one-time) precompute

    # Single fused projection on the MXU; both halves are full 128-lane slabs.
    y = jnp.dot(x, w, preferred_element_type=jnp.float32)       # (nb*seq, 2*HP) f32
    v = y[:, :HP]                                                # value proj (padded)
    k = y[:, HP:]                                                # key proj (padded, pre-scaled)

    kb = k.reshape(nb, seq, HP)
    vb = v.reshape(nb, seq, HP)

    # Scores: q = self.key(x) as in the source, so q == k.  The head_size**(-5)
    # scale was folded into Wk (sqrt(scale) on each operand) at precompute time,
    # so no per-element multiply here.  Zero-padded lanes contribute 0.
    wei = jnp.einsum("btd,bsd->bts",
                     kb.astype(mxu_dtype), kb.astype(mxu_dtype),
                     preferred_element_type=jnp.float32)         # (nb, T, T) f32

    # Additive causal bias from a single 2-D iota pair; one broadcast add over the
    # (nb, T, T) scores instead of per-batch iota + compare + select.
    row = lax.broadcasted_iota(jnp.int32, (seq, seq), 0)
    col = lax.broadcasted_iota(jnp.int32, (seq, seq), 1)
    bias = jnp.where(row >= col, 0.0, -jnp.inf).astype(jnp.float32)  # (T, T)
    wei = wei + bias[None, :, :]

    # Softmax over last dim, all in f32 (diagonal always unmasked -> no NaN rows).
    m = jnp.max(wei, axis=-1, keepdims=True)
    e = jnp.exp(wei - m)
    denom = jnp.sum(e, axis=-1, keepdims=True)
    p = e * pl.reciprocal(denom, approx=True)                    # EUP vrcp slot

    # Dropout is identity in eval/inference mode.
    # TODO(synk): training-mode dropout would need pltpu.prng_seed + prng_random_bits.
    out = jnp.einsum("bts,bsh->bth",
                     p.astype(mxu_dtype), vb.astype(mxu_dtype),
                     preferred_element_type=jnp.float32)         # (nb, T, HP)
    o_ref[...] = out.reshape(nb * seq, HP).astype(o_ref.dtype)


def precompute_fused_weight(w_key, w_value, head_size, mxu_dtype=jnp.float32):
    """One-time parameter precompute (call at init time, NOT per forward).

    Returns (C, 2*HP) fused weight: columns [0:H] = Wv^T, [HP:HP+H] = sqrt(scale)*Wk^T,
    everything else zero.  scale = head_size ** (-5) (faithful to the source) and is
    folded into Wk, which is valid because q == k in this module.
    """
    H, C = w_key.shape
    scale = float(head_size) ** (-5)
    sqrt_scale = scale ** 0.5
    w = jnp.zeros((C, 2 * HP), jnp.float32)
    w = w.at[:, :H].set(w_value.T.astype(jnp.float32))
    w = w.at[:, HP:HP + H].set(w_key.T.astype(jnp.float32) * sqrt_scale)
    return w.astype(mxu_dtype)


@functools.partial(jax.jit, static_argnames=("head_size", "num_chunks", "mxu_dtype"))
def head_forward(x, w_fused, head_size, *, num_chunks=1, mxu_dtype=jnp.float32):
    """Forward pass of `Head` (eval mode).

    x: (B, T, C) float32.  w_fused: (C, 2*HP) from precompute_fused_weight().
    num_chunks: leading 'parallel' grid axis size (1 = single invocation, best at
    small B*T on v5e/v6e/v7x; >1 only once per-chunk work exceeds a few microseconds).
    """
    B, T, C = x.shape
    assert B % num_chunks == 0, "num_chunks must divide batch"
    nb = B // num_chunks
    x_flat = x.reshape(B * T, C)

    kernel = functools.partial(_head_kernel, nb=nb, seq=T, mxu_dtype=mxu_dtype)

    out_pad = pl.pallas_call(
        kernel,
        out_shape=jax.ShapeDtypeStruct((B * T, HP), jnp.float32),
        grid_spec=pltpu.PrefetchScalarGridSpec(
            num_scalar_prefetch=0,
            grid=(num_chunks,),
            in_specs=[
                pl.BlockSpec((nb * T, C), lambda c: (c, 0)),      # per-chunk x slab
                # Same block index every grid step -> stays resident, not re-DMA'd.
                pl.BlockSpec((C, 2 * HP), lambda c: (0, 0)),
            ],
            out_specs=pl.BlockSpec((nb * T, HP), lambda c: (c, 0)),
        ),
        compiler_params=pltpu.CompilerParams(
            dimension_semantics=("parallel",),
            vmem_limit_bytes=32 * 1024 * 1024,
        ),
    )(x_flat, w_fused)

    # Under jit the pad-slice + reshape fuse; no separate wrapper pass.
    return out_pad[:, :head_size].reshape(B, T, head_size)


def head_reference(x, w_key, w_value, head_size):
    """Pure-JAX reference mirroring the PyTorch forward (eval mode)."""
    B, T, C = x.shape
    k = x @ w_key.T
    q = x @ w_key.T                       # q = self.key(x), as in the source
    wei = jnp.einsum("bth,bsh->bts", q, k) * float(head_size) ** (-5)
    tril = jnp.tril(jnp.ones((T, T)))
    wei = jnp.where(tril == 0, -jnp.inf, wei)
    wei = jax.nn.softmax(wei, axis=-1)
    v = x @ w_value.T
    return wei @ v


if __name__ == "__main__":
    # Shapes consistent with the module: block_size=T=8, embedding=32, head=16.
    B, T, C, H = 2, 8, 32, 16

    key = jax.random.PRNGKey(0)
    kx, kw1, kw2 = jax.random.split(key, 3)
    x = jax.random.normal(kx, (B, T, C), dtype=jnp.float32)
    # nn.Linear(embedding_size, head_size, bias=False) -> weight shape (H, C)
    w_key = jax.random.normal(kw1, (H, C), dtype=jnp.float32) * (1.0 / C ** 0.5)
    w_value = jax.random.normal(kw2, (H, C), dtype=jnp.float32) * (1.0 / C ** 0.5)

    ref = head_reference(x, w_key, w_value, H)

    # --- f32 MXU operands (default) -----------------------------------------
    w_fused_f32 = precompute_fused_weight(w_key, w_value, H, mxu_dtype=jnp.float32)
    out1 = jax.block_until_ready(
        head_forward(x, w_fused_f32, H, num_chunks=1, mxu_dtype=jnp.float32))
    out2 = jax.block_until_ready(
        head_forward(x, w_fused_f32, H, num_chunks=2, mxu_dtype=jnp.float32))

    assert out1.shape == (B, T, H) and out2.shape == (B, T, H)
    # approx reciprocal (EUP vrcp) => slightly looser tolerance than exact divide.
    assert jnp.allclose(out1, ref, atol=5e-3, rtol=5e-3), "mismatch (f32, num_chunks=1)"
    assert jnp.allclose(out2, ref, atol=5e-3, rtol=5e-3), "mismatch (f32, num_chunks=2)"

    # --- bf16 MXU operands (v6e/v7x native MXU path); softmax stays f32 ------
    w_fused_bf16 = precompute_fused_weight(w_key, w_value, H, mxu_dtype=jnp.bfloat16)
    out3 = jax.block_until_ready(
        head_forward(x, w_fused_bf16, H, num_chunks=1, mxu_dtype=jnp.bfloat16))
    assert out3.shape == (B, T, H)
    assert jnp.allclose(out3, ref, atol=3e-2, rtol=3e-2), "mismatch (bf16 MXU operands)"

    print("KERNEL_OK")
</pallas_src>

<mosaic_0001>
module attributes {stable_mosaic.version = 11 : i64} {
  func.func @_head_kernel(%arg0: i32, %arg1: memref<16x32xf32, #tpu.memory_space<vmem>>, %arg2: memref<32x256xf32, #tpu.memory_space<vmem>>, %arg3: memref<16x128xf32, #tpu.memory_space<vmem>>) attributes {dimension_semantics = [#tpu.dimension_semantics<parallel>], iteration_bounds = array<i64: 1>, scalar_prefetch = 0 : i64, scratch_operands = 0 : i64, tpu.core_type = #tpu.core_type<tc>, window_params = [{transform_indices = @transform_0, window_bounds = array<i64: 16, 32>}, {pipeline_mode = #tpu.pipeline_mode<synchronous>, transform_indices = @transform_1, window_bounds = array<i64: 32, 256>}, {transform_indices = @transform_2, window_bounds = array<i64: 16, 128>}]} {
    %c0 = arith.constant 0 : index
    %c0_0 = arith.constant 0 : index
    %0 = vector.load %arg1[%c0, %c0_0] : memref<16x32xf32, #tpu.memory_space<vmem>>, vector<16x32xf32>
    %c0_1 = arith.constant 0 : index
    %c0_2 = arith.constant 0 : index
    %1 = vector.load %arg2[%c0_1, %c0_2] : memref<32x256xf32, #tpu.memory_space<vmem>>, vector<32x256xf32>
    %cst = arith.constant dense<0.000000e+00> : vector<16x256xf32>
    %2 = tpu.matmul %0, %1, %cst {dimension_numbers = #tpu.dot_dimension_numbers<[1], [0], [0], [1], [0, 0, 1, 1], [], []>} : vector<16x32xf32>, vector<32x256xf32>, vector<16x256xf32> -> vector<16x256xf32>
    %3 = vector.extract_strided_slice %2 {offsets = [0, 0], sizes = [16, 128], strides = [1, 1]} : vector<16x256xf32> to vector<16x128xf32>
    %4 = vector.extract_strided_slice %2 {offsets = [0, 128], sizes = [16, 128], strides = [1, 1]} : vector<16x256xf32> to vector<16x128xf32>
    %5 = vector.shape_cast %4 : vector<16x128xf32> to vector<2x8x128xf32>
    %6 = vector.shape_cast %3 : vector<16x128xf32> to vector<2x8x128xf32>
    "tpu.trace_start"() <{level = 10 : i32, message = "btd,bsd->bts"}> : () -> ()
    %cst_3 = arith.constant dense<0.000000e+00> : vector<2x8x8xf32>
    %7 = tpu.matmul %5, %5, %cst_3 {dimension_numbers = #tpu.dot_dimension_numbers<[2], [2], [1], [1], [0, 0, 0, 1, 1, 1], [0], [0]>} : vector<2x8x128xf32>, vector<2x8x128xf32>, vector<2x8x8xf32> -> vector<2x8x8xf32>
    "tpu.trace_stop"() : () -> ()
    %8 = tpu.iota {dimensions = array<i32: 0>} : vector<8x8xi32>
    %9 = tpu.iota {dimensions = array<i32: 1>} : vector<8x8xi32>
    %10 = arith.cmpi sge, %8, %9 : vector<8x8xi32>
    %cst_4 = arith.constant 0.000000e+00 : f32
    %cst_5 = arith.constant 0xFF800000 : f32
    %11 = vector.broadcast %cst_4 : f32 to vector<8x8xf32>
    %12 = vector.broadcast %cst_5 : f32 to vector<8x8xf32>
    %13 = arith.select %10, %11, %12 : vector<8x8xi1>, vector<8x8xf32>
    %14 = vector.shape_cast %13 : vector<8x8xf32> to vector<1x8x8xf32>
    %15 = vector.broadcast %14 : vector<1x8x8xf32> to vector<2x8x8xf32>
    %16 = arith.addf %7, %15 : vector<2x8x8xf32>
    %cst_6 = arith.constant dense<0xFF800000> : vector<2x8xf32>
    %17 = vector.multi_reduction <maximumf>, %16, %cst_6 [2] : vector<2x8x8xf32> to vector<2x8xf32>
    %18 = vector.shape_cast %17 : vector<2x8xf32> to vector<2x8x1xf32>
    %19 = vector.broadcast %18 : vector<2x8x1xf32> to vector<2x8x8xf32>
    %20 = arith.subf %16, %19 : vector<2x8x8xf32>
    %21 = math.exp %20 : vector<2x8x8xf32>
    %cst_7 = arith.constant dense<0.000000e+00> : vector<2x8xf32>
    %22 = vector.multi_reduction <add>, %21, %cst_7 [2] : vector<2x8x8xf32> to vector<2x8xf32>
    %23 = vector.shape_cast %22 : vector<2x8xf32> to vector<2x8x1xf32>
    %24 = tpu.reciprocal %23 {approx = true} : vector<2x8x1xf32> -> vector<2x8x1xf32>
    %25 = vector.broadcast %24 : vector<2x8x1xf32> to vector<2x8x8xf32>
    %26 = arith.mulf %21, %25 : vector<2x8x8xf32>
    "tpu.trace_start"() <{level = 10 : i32, message = "bts,bsh->bth"}> : () -> ()
    %cst_8 = arith.constant dense<0.000000e+00> : vector<2x8x128xf32>
    %27 = tpu.matmul %26, %6, %cst_8 {dimension_numbers = #tpu.dot_dimension_numbers<[2], [1], [1], [2], [0, 0, 0, 1, 1, 2], [0], [0]>} : vector<2x8x8xf32>, vector<2x8x128xf32>, vector<2x8x128xf32> -> vector<2x8x128xf32>
    "tpu.trace_stop"() : () -> ()
    %28 = vector.shape_cast %27 : vector<2x8x128xf32> to vector<16x128xf32>
    %c0_9 = arith.constant 0 : index
    %c0_10 = arith.constant 0 : index
    %29 = vector.load %arg3[%c0_9, %c0_10] : memref<16x128xf32, #tpu.memory_space<vmem>>, vector<16x128xf32>
    tpu.vector_store %arg3[%c0_9, %c0_10], %28 {strides = array<i32>} : memref<16x128xf32, #tpu.memory_space<vmem>>, vector<16x128xf32>,
    return
  }
  func.func @transform_0(%arg0: i32) -> (i32, i32) {
    %c0_i32 = arith.constant 0 : i32
    %c0_i32_0 = arith.constant 0 : i32
    return %arg0, %c0_i32 : i32, i32
  }
  func.func @transform_1(%arg0: i32) -> (i32, i32) {
    %c0_i32 = arith.constant 0 : i32
    %c0_i32_0 = arith.constant 0 : i32
    %c0_i32_1 = arith.constant 0 : i32
    return %c0_i32, %c0_i32_0 : i32, i32
  }
  func.func @transform_2(%arg0: i32) -> (i32, i32) {
    %c0_i32 = arith.constant 0 : i32
    %c0_i32_0 = arith.constant 0 : i32
    return %arg0, %c0_i32 : i32, i32
  }
}

</mosaic_0001>

<bundles_post_ra>
// kernel: head_forward.1
= control target key start
LH: loop header
LB: loop body
LE: loop exit
PB: predicated region body
PF: predicated region fallthrough
CT: control target
= control target key end

     0   :  { %7 = vsyncpa [#allocation3], 0  ;;  %s625_s0 = inlined_call_operand.hbm [shape: f32[16,32], index: 0, kind: input, shape index: {}]   ;;  %s626_s1 = inlined_call_operand.hbm [shape: f32[32,256], index: 1, kind: input, shape index: {}]   ;;  %s627_s2 = inlined_call_operand.vmem [shape: f32[16,128], index: 2, kind: output, shape index: {}]  }
   0x1   :  { %8 = vsyncpa [#allocation5], 0  ;;  %s561_s9 = smov [#allocation2]   ;;  %s513_s13 = scalar_lea.hbm %s625_s0, 256 }
   0x2   :  { %s14_s10 = sshll.u32 %s561_s9, 4  ;;  %p514_p0 = scmp.ne.s32.totalorder %s625_s0, %s513_s13  ;;  %s15_s10 = int_to_ptr.vmem [resolvable:$true] %s14_s10 }
   0x3   :  { %p517_p1 = scmp.lt.u32.totalorder %s513_s13, %s625_s0 }
   0x5   :  { %p519_p2 = pnand %p517_p1, %p514_p0 }
   0x7   :  { %522 = shalt.err (!%p519_p2)
}
   0x8   :  { %s523_s18 = scalar_lea.vmem %s15_s10, 256  ;;  %p528_p4 = scmp.lt.s32.totalorder %s15_s10, %s15_s10 }
   0x9   :  { %p524_p3 = scmp.ne.s32.totalorder %s15_s10, %s523_s18  ;;  %p529_p5 = scmp.lt.s32.totalorder %s523_s18, %s523_s18 }
   0xb   :  { %p530_p6 = por %p529_p5, %p528_p4 }
   0xd   :  { %p531_p7 = pnand %p530_p6, %p524_p3 }
   0xf   :  { %534 = shalt.err (!%p531_p7)
}
  0x10   :  { %s562_s19 = smov 128   ;;  %s563_s20 = smov 8  }
  0x11   :  { %20 = dma.hbm_to_vmem [thread:$0]  %s625_s0, 256, %s15_s10, [#allocation3], %s562_s19, %s562_s19, %s563_s20  }
  0x12   :  { %s564_s23 = smov [#allocation4]   ;;  %s535_s27 = scalar_lea.hbm %s626_s1, 1024 }
  0x13   :  { %s26_s24 = sshll.u32 %s564_s23, 4  ;;  %p536_p8 = scmp.ne.s32.totalorder %s626_s1, %s535_s27  ;;  %s27_s24 = int_to_ptr.vmem [resolvable:$true] %s26_s24 }
  0x14   :  { %p539_p9 = scmp.lt.u32.totalorder %s535_s27, %s626_s1 }
  0x16   :  { %p541_p10 = pnand %p539_p9, %p536_p8 }
  0x18   :  { %544 = shalt.err (!%p541_p10)
}
  0x19   :  { %s545_s4 = scalar_lea.vmem %s27_s24, 1024  ;;  %p550_p12 = scmp.lt.s32.totalorder %s27_s24, %s27_s24 }
  0x1a   :  { %p546_p11 = scmp.ne.s32.totalorder %s27_s24, %s545_s4  ;;  %p551_p13 = scmp.lt.s32.totalorder %s545_s4, %s545_s4 }
  0x1c   :  { %p552_p0 = por %p551_p13, %p550_p12 }
  0x1e   :  { %p553_p1 = pnand %p552_p0, %p546_p11 }
  0x20   :  { %556 = shalt.err (!%p553_p1)
}
  0x21   :  { %s565_s0 = smov 256   ;;  %s566_s5 = smov 16  }
  0x22   :  { %32 = dma.hbm_to_vmem [thread:$0]  %s626_s1, 1024, %s27_s24, [#allocation5], %s565_s0, %s565_s0, %s566_s5  }
  0x23   :  { %557 = dma.done.wait [#allocation3], 256  }
  0x24   :  { %558 = vsyncadd [#allocation3], 4294967040 }
  0x25   :  { %559 = dma.done.wait [#allocation5], 1024  }
  0x26   :  { %560 = vsyncadd [#allocation5], 4294966272  ;;  %v567_v0 = vmov 0.0   ;;  %v42_v1 = vld [vmem:[#allocation4 + $0x8] sm:$0xff]  ;;  %v44_v2 = vld [vmem:[#allocation4 + $0x18] sm:$0xff]  ;;  %vm49_vm0 = vcmask 261120   ;;  %v133_v19 = vlaneseq }
  0x27   :  { %120 = vmatprep.mubr.f32.mxu0 %v567_v0  ;;  %468 = vmatprep.subr.mxu1 %v567_v0  ;;  %v41_v3 = vld [vmem:[#allocation4] sm:$0xff]  ;;  %v488_v4 = vpack.c.bf16 %v44_v2, %v42_v1  ;;  %v43_v5 = vld [vmem:[#allocation4 + $0x10] sm:$0xff]  ;;  %v46_v6 = vld [vmem:[#allocation4 + $0x28] sm:$0xff]  ;;  %vm568_vm1 = vmmov 0   ;;  %v569_v22 = vmov -inf   ;;  %vm279_vm3 = vcmask 64512  }
  0x28   :  { %v48_v7 = vld [vmem:[#allocation4 + $0x38] sm:$0xff]  ;;  %v490_v8 = vpack.c.bf16 %v43_v5, %v41_v3  ;;  %v45_v10 = vld [vmem:[#allocation4 + $0x20] sm:$0xff]  ;;  %v47_v11 = vld [vmem:[#allocation4 + $0x30] sm:$0xff]  ;;  %470 = vmatprep.mubr.msk.f32.mxu1 %vm568_vm1, %v567_v0  ;;  %v134_v20 = vshrl.u32 %v133_v19, 7  ;;  %v136_v21 = vand.u32 127, %v133_v19 }
  0x29   :  { %v492_v9 = vpack.c.bf16 %v48_v7, %v46_v6  ;;  %489 = vmatprep.subr.bf16.mxu0 %v488_v4  ;;  %v494_v12 = vpack.c.bf16 %v47_v11, %v45_v10  ;;  %v39_v13 = vld [vmem:[#allocation2] sm:$0xff]  ;;  %v40_v14 = vld [vmem:[#allocation2 + $0x8] sm:$0xff] }
  0x2a   :  { %491 = vmatpush1.bf16.msra.mxu0 %v490_v8  ;;  %vm137_vm2 = vcmp.ge.s32.totalorder %v134_v20, %v136_v21 }
  0x2b   :  { %493 = vmatprep.subr.bf16.mxu0 %v492_v9  ;;  %v138_v23 = vsel %vm137_vm2, 0.0, %v569_v22 }
  0x2e   :  { %495 = vmatpush1.bf16.msra.mxu0 %v494_v12 }
  0x2f   :  { %483 = vmatprep.subr.mxu0 %v567_v0 }
  0x31   :  { %456 = vmatmul.mubr.msk.f32.vlgmr.msra.gmra.mrb[0].mxu0 %vm49_vm0, %v39_v13 }
  0x32   :  { %126 = vmatprep.mubr.f32.mxu0 %v567_v0 }
  0x35   :  { %457 = vmatmul.mubr.msk.f32.gmra.mrb[2].mxu0 %vm49_vm0, %v40_v14 }
  0x36   :  { %485 = vmatprep.mubr.msk.f32.mxu0 %vm568_vm1, %v567_v0 }
 0x104   :  { %v122_v15 = vpop.f32.mrb[0].mxu0 }
 0x105   :  { %v124_v16 = vpop.f32.mrb[1].mxu0 }
 0x106   :  { %469 = vmatpush3.xpose.msra.mxu1 %v124_v16 }
 0x107   :  { %473 = vmatprep.subr.mxu1 %v567_v0 }
 0x108   :  { %v128_v17 = vpop.f32.mrb[2].mxu0 }
 0x109   :  { %v130_v18 = vpop.f32.mrb[3].mxu0  ;;  %471 = vmatmul.mubr.f32.vlgmr.msra.gmra.mrb[0].mxu1 %v124_v16  ;;  %484 = vmatpush3.msra.mxu0 %v128_v17 }
 0x10a   :  { %474 = vmatpush3.xpose.msra.mxu1 %v130_v18  ;;  %475 = vmatprep.mubr.msk.f32.mxu1 %vm568_vm1, %v567_v0 }
 0x10b   :  { %478 = vmatprep.subr.mxu1 %v567_v0 }
 0x10d   :  { %476 = vmatmul.mubr.f32.vlgmr.msra.gmra.mrb[2].mxu1 %v130_v18 }
 0x10e   :  { %479 = vmatpush3.msra.mxu1 %v122_v15  ;;  %480 = vmatprep.mubr.msk.f32.mxu1 %vm568_vm1, %v567_v0 }
 0x1dc   :  { %v205_v24 = vpop.f32.mrb[0].mxu1 }
 0x1dd   :  { %v206_v25 = vadd.f32 %v205_v24, %v138_v23  ;;  %v472_v26 = vpop.f32.mrb[1].mxu1 }
 0x1df   :  { %v280_v27 = vsel %vm279_vm3, %v206_v25, -inf }
 0x1e0   :  { %281 = vmax.xlane.f32.xlu0 %v280_v27  ;;  %v275_v28 = vpop.f32.mrb[2].mxu1 }
 0x1e1   :  { %v276_v29 = vadd.f32 %v275_v28, %v138_v23  ;;  %v477_v30 = vpop.f32.mrb[3].mxu1 }
 0x1e3   :  { %v283_v31 = vsel %vm279_vm3, %v276_v29, -inf }
 0x1e4   :  { %284 = vmax.xlane.f32.xlu0 %v283_v31 }
 0x26d   :  { %v282_v32 = vpop.xlane.xlu0 %281 }
 0x26e   :  { %v286_v33 = vsub.f32 %v206_v25, %v282_v32 }
 0x270   :  { %v288_v34 = vmul.f32 1.442695, %v286_v33 }
 0x271   :  { %v285_v35 = vpop.xlane.xlu0 %284 }
 0x272   :  { %505 = vpow2.f32 %v288_v34  ;;  %v287_v36 = vsub.f32 %v276_v29, %v285_v35 }
 0x274   :  { %v290_v37 = vmul.f32 1.442695, %v287_v36 }
 0x276   :  { %507 = vpow2.f32 %v290_v37 }
 0x27c   :  { %v506_v38 = vpop.eup %505 }
 0x27d   :  { %v292_v39 = vsel %vm279_vm3, %v506_v38, 0.0 }
 0x27e   :  { %293 = vadd.xlane.f32.xlu1 %v292_v39 }
 0x280   :  { %v508_v40 = vpop.eup %507 }
 0x281   :  { %v295_v41 = vsel %vm279_vm3, %v508_v40, 0.0 }
 0x282   :  { %296 = vadd.xlane.f32.xlu1 %v295_v41 }
 0x30b   :  { %v294_v42 = vpop.xlane.xlu1 %293 }
 0x30c   :  { %509 = vrcp.f32 %v294_v42 }
 0x30f   :  { %v297_v43 = vpop.xlane.xlu1 %296 }
 0x310   :  { %511 = vrcp.f32 %v297_v43 }
 0x316   :  { %v510_v44 = vpop.eup %509 }
 0x317   :  { %v300_v45 = vmul.f32 %v510_v44, %v506_v38 }
 0x319   :  { %481 = vmatmul.mubr.msk.f32.vlgmr.msra.gmra.mrb[4].mxu1 %vm279_vm3, %v300_v45 }
 0x31a   :  { %v512_v46 = vpop.eup %511 }
 0x31b   :  { %v301_v47 = vmul.f32 %v512_v46, %v508_v40 }
 0x31d   :  { %486 = vmatmul.mubr.msk.f32.vlgmr.msra.gmra.mrb[4].mxu0 %vm279_vm3, %v301_v47 }
 0x3ec   :  { %v371_v48 = vpop.f32.mrb[4].mxu1 }
 0x3ed   :  { %448 = vst [vmem:[%s627_s2] sm:$0xff] %v371_v48  ;;  %v482_v49 = vpop.f32.mrb[5].mxu1 }
 0x3f0   :  { %v444_v50 = vpop.f32.mrb[4].mxu0 }
 0x3f1   :  { %449 = vst [vmem:[%s627_s2 + $0x8] sm:$0xff] %v444_v50  ;;  %v487_v51 = vpop.f32.mrb[5].mxu0 }
 0x3f2   :  { %454 = vsyncpa [#allocation3], 1 }
 0x3f3   :  { %455 = vsyncpa [#allocation5], 1 }

</bundles_post_ra>
